<compile_context>
chip_gen: v5e
topology: v5e:2x2
jax: 0.10.0
libtpu: 0.0.40
codegen_flags: <defaults>
</compile_context>

<pallas_src>
import math
import functools
from typing import NamedTuple

import jax
import jax.numpy as jnp
import numpy as np
from jax import lax
from jax.experimental import pallas as pl
from jax.experimental.pallas import tpu as pltpu

# ---- module hyper-parameters (match adLMLIFLayer.__init__) ------------------
ALPHA_LIM = (float(np.exp(-1.0 / 5.0)), float(np.exp(-1.0 / 25.0)))
BETA_LIM = (float(np.exp(-1.0 / 30.0)), float(np.exp(-1.0 / 120.0)))
A_LIM = (-1.0, 1.0)
B_LIM = (0.0, 2.0)
BN_EPS = 1e-5
THRESHOLD = 1.0

LANE = 128
MIB = 1024 * 1024


def _round_up(x, m):
    return (x + m - 1) // m * m


# ---- generation-aware VMEM policy -------------------------------------------
def _vmem_capacity_bytes():
    try:
        info = pltpu.get_tpu_info()
        cap = getattr(info, "vmem_capacity_bytes", None)
        if cap:
            return int(cap)
    except Exception:
        pass
    return 128 * MIB  # v5e/v6e default


def _single_bytes(n_rows, j_pad, ti):
    """Per-grid-step VMEM working set of the single-pass kernel.
    The constant x block is still counted double-buffered (pipeline default)."""
    x = 2 * n_rows * j_pad * 2          # bf16 activations
    w = 2 * j_pad * ti * 2              # bf16 weight tile
    out = 2 * n_rows * ti * 4           # f32 output tile
    tmp = 2 * n_rows * ti * 4           # h + one elementwise temp
    par = 2 * 4 * ti * 4
    return x + w + out + tmp + par


def _pass2_bytes(t, tb, j_pad, ti):
    rows = t * tb
    return (2 * rows * j_pad * 2 + 2 * j_pad * ti * 2 +
            2 * rows * ti * 4 + 2 * rows * ti * 4 + 2 * 6 * ti * 4)


def _stats_bytes(tr, j_pad, ti):
    return 2 * tr * j_pad * 2 + 2 * j_pad * ti * 2 + 2 * tr * ti * 4 + 4 * ti * 4


class _Plan(NamedTuple):
    two_pass: bool
    b_pad: int
    j_pad: int
    i_pad: int
    tile_i: int
    tile_b: int
    tile_r: int
    unroll: int
    vmem_limit: int


def _plan(B, T, J, I, force_two_pass=False):
    j_pad = _round_up(J, LANE)
    i_pad = _round_up(I, LANE)

    cap = _vmem_capacity_bytes()
    big_vmem = cap >= 100 * MIB
    if big_vmem:                       # v5e / v6e : 128 MiB VMEM
        budget, limit_cap = 48 * MIB, 96 * MIB
        ti_cands = (1024, 512, 256, 128)
        min_i_steps = 1
    else:                              # v7x-like : 64 MiB per TensorCore
        budget, limit_cap = 22 * MIB, 48 * MIB
        ti_cands = (512, 256, 128)
        min_i_steps = 2                # keep >=2 channel steps for both TCs

    b_pad8 = _round_up(max(B, 1), 8)
    single_ok = (not force_two_pass) and (
        _single_bytes(T * b_pad8, j_pad, LANE) <= budget)

    if single_ok:
        b_pad = b_pad8
        n_rows = T * b_pad
        msteps = max(1, min(min_i_steps, i_pad // LANE))
        tile_i = LANE
        for ti in ti_cands:
            if (i_pad % ti == 0 and i_pad // ti >= msteps
                    and _single_bytes(n_rows, j_pad, ti) <= budget):
                tile_i = ti
                break
        need = _single_bytes(n_rows, j_pad, tile_i)
        limit = int(min(max(need + need // 2, 16 * MIB), limit_cap))
        unroll = T if T <= 8 else (4 if tile_i >= 512 else 8)
        return _Plan(False, b_pad, j_pad, i_pad, tile_i, b_pad, 0, unroll, limit)

    # ---- batch-tiled two-pass path ----
    b_pad = _round_up(max(B, 1), 16)   # 16: keep bf16 packing intact per tile
    n_rows = T * b_pad
    tb_cands = [tb for tb in (512, 256, 128, 64, 32, 16)
                if tb <= b_pad and b_pad % tb == 0]
    if b_pad not in tb_cands:
        tb_cands = [b_pad] + tb_cands

    tile_i, tile_b = LANE, tb_cands[-1]
    found = False
    for ti in ti_cands:
        if i_pad % ti:
            continue
        for tb in tb_cands:
            if _pass2_bytes(T, tb, j_pad, ti) <= budget:
                tile_i, tile_b = ti, tb
                found = True
                break
        if found:
            break

    tile_r = 16
    for tr in (2048, 1024, 512, 256, 128, 64, 32, 16):
        if n_rows % tr == 0 and _stats_bytes(tr, j_pad, tile_i) <= budget:
            tile_r = tr
            break

    need = max(_pass2_bytes(T, tile_b, j_pad, tile_i),
               _stats_bytes(tile_r, j_pad, tile_i))
    limit = int(min(max(need + need // 2, 16 * MIB), limit_cap))
    unroll = T if T <= 8 else (4 if tile_i >= 512 else 8)
    return _Plan(True, b_pad, j_pad, i_pad, tile_i, tile_b, tile_r, unroll, limit)


# ---- kernels -----------------------------------------------------------------
def _lif_inplace(h_norm, out_ref, alpha, beta, a, b, threshold, unroll):
    """Stage normalized activations in out_ref, then run the soft-reset
    adaptive-LIF recurrence in place.  out_ref: (T, B_rows, TILE_I) f32,
    params are (1, TILE_I) rows (sublane-broadcast at use)."""
    t_steps, b_rows, tile_i = out_ref.shape
    out_ref[...] = h_norm.reshape(t_steps, b_rows, tile_i)

    theta = jnp.float32(threshold)
    beta_theta = beta * theta          # fused constant (drops a per-step mul)
    one_m_beta = 1.0 - beta
    zeros = jnp.zeros((b_rows, tile_i), jnp.float32)

    def body(t, carry):
        ut, wt, st = carry
        xt = out_ref[t]                                     # (B_rows, TILE_I)
        wt = alpha * wt + a * ut + b * st
        ut = beta * ut - beta_theta * st + one_m_beta * (xt - wt)
        st = (ut >= theta).astype(jnp.float32)              # ATan fwd = heaviside
        out_ref[t] = st                                     # in-place spikes
        return (ut, wt, st)

    lax.fori_loop(0, t_steps, body, (zeros, zeros, zeros), unroll=unroll)


def _adlmlif_single_kernel(x_ref, wt_ref, al_ref, be_ref, a_ref, b_ref, out_ref,
                           *, n_real, threshold, unroll):
    """x_ref: [T*B_pad, J_pad] bf16    wt_ref: [J_pad, TILE_I] bf16
    params: [1, TILE_I] f32            out_ref: [T, B_pad, TILE_I] f32."""
    alpha = jnp.clip(al_ref[...], ALPHA_LIM[0], ALPHA_LIM[1])
    beta = jnp.clip(be_ref[...], BETA_LIM[0], BETA_LIM[1])
    a = jnp.clip(a_ref[...], A_LIM[0], A_LIM[1])
    b = jnp.clip(b_ref[...], B_LIM[0], B_LIM[1])

    # MXU matmul; pre-transposed weight => contraction on the RHS leading dim.
    h = lax.dot_general(x_ref[...], wt_ref[...],
                        dimension_numbers=(((1,), (0,)), ((), ())),
                        preferred_element_type=jnp.float32)

    # BatchNorm1d training-mode stats (biased var).  Two-pass (centered) form
    # for numerical safety; exact correction for the zero-padded rows.
    n_total = h.shape[0]
    n_pad = n_total - n_real
    inv_n = jnp.float32(1.0 / n_real)
    mean = jnp.sum(h, axis=0, keepdims=True) * inv_n
    cent = h - mean
    ssq = jnp.sum(cent * cent, axis=0, keepdims=True)
    var = jnp.maximum((ssq - float(n_pad) * mean * mean) * inv_n, 0.0)
    h_norm = cent * lax.rsqrt(var + BN_EPS)                 # gamma=1, beta=0

    _lif_inplace(h_norm, out_ref, alpha, beta, a, b, threshold, unroll)


def _bn_stats_kernel(x_ref, wt_ref, s1_ref, s2_ref, acc1, acc2):
    """Pass 1 of the batch-tiled path: per-channel sum / sum-of-squares of h."""
    r = pl.program_id(1)

    @pl.when(r == 0)
    def _():
        acc1[...] = jnp.zeros_like(acc1)
        acc2[...] = jnp.zeros_like(acc2)

    h = lax.dot_general(x_ref[...], wt_ref[...],
                        dimension_numbers=(((1,), (0,)), ((), ())),
                        preferred_element_type=jnp.float32)
    acc1[...] += jnp.sum(h, axis=0, keepdims=True)
    acc2[...] += jnp.sum(h * h, axis=0, keepdims=True)

    @pl.when(r == pl.num_programs(1) - 1)
    def _():
        s1_ref[...] = acc1[...]
        s2_ref[...] = acc2[...]


def _adlmlif_norm_lif_kernel(x_ref, wt_ref, mean_ref, istd_ref,
                             al_ref, be_ref, a_ref, b_ref, out_ref,
                             *, threshold, unroll):
    """Pass 2: x_ref [T, TILE_B, J_pad] bf16, wt_ref [J_pad, TILE_I] bf16,
    mean/istd/params [1, TILE_I] f32, out_ref [T, TILE_B, TILE_I] f32."""
    t_steps, tile_b, j_pad = x_ref.shape

    alpha = jnp.clip(al_ref[...], ALPHA_LIM[0], ALPHA_LIM[1])
    beta = jnp.clip(be_ref[...], BETA_LIM[0], BETA_LIM[1])
    a = jnp.clip(a_ref[...], A_LIM[0], A_LIM[1])
    b = jnp.clip(b_ref[...], B_LIM[0], B_LIM[1])

    # TILE_B is a multiple of 16, so this reshape is layout-preserving for bf16.
    x2 = x_ref[...].reshape(t_steps * tile_b, j_pad)
    h = lax.dot_general(x2, wt_ref[...],
                        dimension_numbers=(((1,), (0,)), ((), ())),
                        preferred_element_type=jnp.float32)
    h_norm = (h - mean_ref[...]) * istd_ref[...]

    _lif_inplace(h_norm, out_ref, alpha, beta, a, b, threshold, unroll)


# ---- wrappers ----------------------------------------------------------------
def _pad_params(params, I, i_pad):
    return [jnp.pad(p.astype(jnp.float32), (0, i_pad - I)).reshape(1, i_pad)
            for p in params]


@functools.partial(jax.jit, static_argnums=(6, 7))
def _forward_single(x, W, alpha, beta, a, b, threshold, plan):
    B, T, J = x.shape
    I = W.shape[0]
    b_pad, j_pad, i_pad, ti = plan.b_pad, plan.j_pad, plan.i_pad, plan.tile_i
    n_rows = T * b_pad

    # Time-major flatten + pad + bf16 cast in the wrapper (layout plumbing).
    x_tm = jnp.transpose(x, (1, 0, 2))                               # (T,B,J)
    x_tm = jnp.pad(x_tm, ((0, 0), (0, b_pad - B), (0, j_pad - J)))
    x2 = x_tm.reshape(n_rows, j_pad).astype(jnp.bfloat16)
    w_t = jnp.pad(W, ((0, i_pad - I), (0, j_pad - J))).T.astype(jnp.bfloat16)
    params = _pad_params((alpha, beta, a, b), I, i_pad)

    kernel = functools.partial(_adlmlif_single_kernel, n_real=T * B,
                               threshold=threshold, unroll=plan.unroll)
    param_spec = pl.BlockSpec((1, ti), lambda i: (0, i))
    num_i = i_pad // ti
    flops = 2 * n_rows * j_pad * i_pad
    bytes_acc = n_rows * j_pad * 2 + i_pad * j_pad * 2 + T * b_pad * i_pad * 4

    out_tm = pl.pallas_call(
        kernel,
        out_shape=jax.ShapeDtypeStruct((T, b_pad, i_pad), jnp.float32),
        grid_spec=pltpu.PrefetchScalarGridSpec(
            num_scalar_prefetch=0,
            grid=(num_i,),
            in_specs=[
                pl.BlockSpec((n_rows, j_pad), lambda i: (0, 0)),     # x (shared)
                pl.BlockSpec((j_pad, ti), lambda i: (0, i)),         # W^T tile
                param_spec, param_spec, param_spec, param_spec,
            ],
            out_specs=pl.BlockSpec((T, b_pad, ti), lambda i: (0, 0, i))),
        compiler_params=pltpu.CompilerParams(
            dimension_semantics=("parallel",),
            vmem_limit_bytes=plan.vmem_limit),
        cost_estimate=pl.CostEstimate(flops=flops, transcendentals=i_pad,
                                      bytes_accessed=bytes_acc),
    )(x2, w_t, *params)

    out = out_tm[:, :B, :I]                                          # (T,B,I)
    return jnp.transpose(out, (1, 0, 2))


@functools.partial(jax.jit, static_argnums=(6, 7))
def _forward_two_pass(x, W, alpha, beta, a, b, threshold, plan):
    B, T, J = x.shape
    I = W.shape[0]
    b_pad, j_pad, i_pad = plan.b_pad, plan.j_pad, plan.i_pad
    ti, tb, tr = plan.tile_i, plan.tile_b, plan.tile_r
    n_rows = T * b_pad
    n_real = T * B

    x_tm = jnp.transpose(x, (1, 0, 2))
    x_tm = jnp.pad(x_tm, ((0, 0), (0, b_pad - B), (0, j_pad - J)))
    x_tm = x_tm.astype(jnp.bfloat16)                                 # (T,Bp,Jp)
    w_t = jnp.pad(W, ((0, i_pad - I), (0, j_pad - J))).T.astype(jnp.bfloat16)
    params = _pad_params((alpha, beta, a, b), I, i_pad)

    num_i = i_pad // ti
    num_b = b_pad // tb
    num_r = n_rows // tr

    # ---- pass 1: per-channel batch statistics (tiny stats kernel) ----
    x2 = x_tm.reshape(n_rows, j_pad)
    s1, s2 = pl.pallas_call(
        _bn_stats_kernel,
        out_shape=(jax.ShapeDtypeStruct((1, i_pad), jnp.float32),
                   jax.ShapeDtypeStruct((1, i_pad), jnp.float32)),
        grid_spec=pltpu.PrefetchScalarGridSpec(
            num_scalar_prefetch=0,
            grid=(num_i, num_r),
            in_specs=[
                pl.BlockSpec((tr, j_pad), lambda i, r: (r, 0)),
                pl.BlockSpec((j_pad, ti), lambda i, r: (0, i)),
            ],
            out_specs=(pl.BlockSpec((1, ti), lambda i, r: (0, i)),
                       pl.BlockSpec((1, ti), lambda i, r: (0, i))),
            scratch_shapes=[pltpu.VMEM((1, ti), jnp.float32),
                            pltpu.VMEM((1, ti), jnp.float32)]),
        compiler_params=pltpu.CompilerParams(
            dimension_semantics=("parallel", "arbitrary"),
            vmem_limit_bytes=plan.vmem_limit),
        cost_estimate=pl.CostEstimate(
            flops=2 * n_rows * j_pad * i_pad, transcendentals=0,
            bytes_accessed=n_rows * j_pad * 2 + i_pad * j_pad * 2),
    )(x2, w_t)

    inv_n = 1.0 / n_real
    mean = s1 * inv_n
    # E[x^2]-E[x]^2 with clamp; exact because padded rows contribute zero.
    var = jnp.maximum(s2 * inv_n - mean * mean, 0.0)
    istd = lax.rsqrt(var + BN_EPS)

    # ---- pass 2: normalize + recurrence, tiled over (channels, batch) ----
    kernel = functools.partial(_adlmlif_norm_lif_kernel,
                               threshold=threshold, unroll=plan.unroll)
    param_spec = pl.BlockSpec((1, ti), lambda i, bb: (0, i))
    flops = 2 * n_rows * j_pad * i_pad
    bytes_acc = (num_i * n_rows * j_pad * 2 + i_pad * j_pad * 2 +
                 n_rows * i_pad * 4)

    out_tm = pl.pallas_call(
        kernel,
        out_shape=jax.ShapeDtypeStruct((T, b_pad, i_pad), jnp.float32),
        grid_spec=pltpu.PrefetchScalarGridSpec(
            num_scalar_prefetch=0,
            grid=(num_i, num_b),
            in_specs=[
                pl.BlockSpec((T, tb, j_pad), lambda i, bb: (0, bb, 0)),
                pl.BlockSpec((j_pad, ti), lambda i, bb: (0, i)),
                param_spec, param_spec,                              # mean, istd
                param_spec, param_spec, param_spec, param_spec,      # alpha..b
            ],
            out_specs=pl.BlockSpec((T, tb, ti), lambda i, bb: (0, bb, i))),
        compiler_params=pltpu.CompilerParams(
            dimension_semantics=("parallel", "parallel"),
            vmem_limit_bytes=plan.vmem_limit),
        cost_estimate=pl.CostEstimate(flops=flops, transcendentals=i_pad,
                                      bytes_accessed=bytes_acc),
    )(x_tm, w_t, mean, istd, *params)

    out = out_tm[:, :B, :I]
    return jnp.transpose(out, (1, 0, 2))


def adlmlif_forward(x, W, alpha, beta, a, b, threshold=THRESHOLD,
                    force_two_pass=False):
    """x: [B, T, J] float32.  Returns spikes [B, T, I] float32."""
    B, T, J = x.shape
    I = W.shape[0]
    plan = _plan(B, T, J, I, force_two_pass=force_two_pass)
    if plan.two_pass:
        return _forward_two_pass(x, W, alpha, beta, a, b, float(threshold), plan)
    return _forward_single(x, W, alpha, beta, a, b, float(threshold), plan)


# ---- pure-JAX reference (same bf16-quantized matmul, f32 elsewhere) ----------
def adlmlif_reference(x, W, alpha, beta, a, b, threshold=THRESHOLD):
    B, T, J = x.shape
    I = W.shape[0]
    alpha = jnp.clip(alpha, ALPHA_LIM[0], ALPHA_LIM[1])
    beta = jnp.clip(beta, BETA_LIM[0], BETA_LIM[1])
    a = jnp.clip(a, A_LIM[0], A_LIM[1])
    b = jnp.clip(b, B_LIM[0], B_LIM[1])
    h = jnp.einsum("btj,ij->bti", x.astype(jnp.bfloat16),
                   W.astype(jnp.bfloat16),
                   preferred_element_type=jnp.float32)
    hm = h.reshape(B * T, I)
    mean = hm.mean(axis=0)
    var = ((hm - mean) ** 2).mean(axis=0)
    hn = ((hm - mean) * lax.rsqrt(var + BN_EPS)).reshape(B, T, I)

    def step(carry, xt):
        ut, wt, st = carry
        wt = alpha * wt + a * ut + b * st
        ut = beta * (ut - threshold * st) + (1.0 - beta) * (xt - wt)
        st = (ut >= threshold).astype(jnp.float32)
        return (ut, wt, st), st

    z = jnp.zeros((B, I), jnp.float32)
    _, o = lax.scan(step, (z, z, z), jnp.transpose(hn, (1, 0, 2)))
    return jnp.transpose(o, (1, 0, 2))


# ---- parameter init matching the module's __init__ ---------------------------
def init_params(key, hidden_size, input_dim):
    kW, ka, kb, kaa, kbb = jax.random.split(key, 5)
    # kaiming_uniform_(W, a=sqrt(5)) -> U(-1/sqrt(fan_in), 1/sqrt(fan_in))
    bound = 1.0 / math.sqrt(input_dim)
    W = jax.random.uniform(kW, (hidden_size, input_dim), jnp.float32,
                           -bound, bound)
    alpha = jax.random.uniform(ka, (hidden_size,), jnp.float32,
                               ALPHA_LIM[0], ALPHA_LIM[1])
    beta = jax.random.uniform(kb, (hidden_size,), jnp.float32,
                              BETA_LIM[0], BETA_LIM[1])
    a = jax.random.uniform(kaa, (hidden_size,), jnp.float32,
                           A_LIM[0], A_LIM[1])
    b = jax.random.uniform(kbb, (hidden_size,), jnp.float32,
                           B_LIM[0], B_LIM[1])
    return W, alpha, beta, a, b


if __name__ == "__main__":
    # Small shapes consistent with forward(): x is [B, T, J].
    B, T, J, I = 2, 8, 16, 32

    key = jax.random.PRNGKey(0)
    kx, kp = jax.random.split(key)
    x = jax.random.normal(kx, (B, T, J), jnp.float32)
    W, alpha, beta, a, b = init_params(kp, hidden_size=I, input_dim=J)

    # Default (single-pass, channel-tiled) path.
    out = jax.block_until_ready(
        adlmlif_forward(x, W, alpha, beta, a, b, threshold=THRESHOLD))
    assert out.shape == (B, T, I)
    assert bool(jnp.all((out == 0.0) | (out == 1.0)))

    # Exercise the batch-tiled two-pass path as well.
    out2 = jax.block_until_ready(
        adlmlif_forward(x, W, alpha, beta, a, b, threshold=THRESHOLD,
                        force_two_pass=True))
    assert out2.shape == (B, T, I)
    assert bool(jnp.all((out2 == 0.0) | (out2 == 1.0)))

    # Loose spike-parity check against a pure-JAX reference (rounding-order
    # differences can flip spikes only when Ut is within ~1e-6 of threshold).
    ref = adlmlif_reference(x, W, alpha, beta, a, b, threshold=THRESHOLD)
    mism1 = float(jnp.mean(jnp.abs(out - ref)))
    mism2 = float(jnp.mean(jnp.abs(out2 - ref)))
    assert mism1 <= 0.05 and mism2 <= 0.05, (mism1, mism2)

    print("KERNEL_OK")
</pallas_src>

<mosaic_0001>
module attributes {stable_mosaic.version = 11 : i64} {
  func.func @_adlmlif_single_kernel(%arg0: i32, %arg1: memref<64x128xbf16, #tpu.memory_space<vmem>>, %arg2: memref<128x128xbf16, #tpu.memory_space<vmem>>, %arg3: memref<1x128xf32, #tpu.memory_space<vmem>>, %arg4: memref<1x128xf32, #tpu.memory_space<vmem>>, %arg5: memref<1x128xf32, #tpu.memory_space<vmem>>, %arg6: memref<1x128xf32, #tpu.memory_space<vmem>>, %arg7: memref<8x8x128xf32, #tpu.memory_space<vmem>>) attributes {dimension_semantics = [#tpu.dimension_semantics<parallel>], iteration_bounds = array<i64: 1>, scalar_prefetch = 0 : i64, scratch_operands = 0 : i64, tpu.core_type = #tpu.core_type<tc>, window_params = [{pipeline_mode = #tpu.pipeline_mode<synchronous>, transform_indices = @transform_0, window_bounds = array<i64: 64, 128>}, {transform_indices = @transform_1, window_bounds = array<i64: 128, 128>}, {transform_indices = @transform_2, window_bounds = array<i64: 1, 128>}, {transform_indices = @transform_3, window_bounds = array<i64: 1, 128>}, {transform_indices = @transform_4, window_bounds = array<i64: 1, 128>}, {transform_indices = @transform_5, window_bounds = array<i64: 1, 128>}, {transform_indices = @transform_6, window_bounds = array<i64: 8, 8, 128>}]} {
    %c0 = arith.constant 0 : index
    %c0_0 = arith.constant 0 : index
    %0 = vector.load %arg3[%c0, %c0_0] : memref<1x128xf32, #tpu.memory_space<vmem>>, vector<1x128xf32>
    %cst = arith.constant 0.818730771 : f32
    %cst_1 = arith.constant 0.960789442 : f32
    %1 = vector.broadcast %cst : f32 to vector<1x128xf32>
    %2 = arith.maximumf %1, %0 : vector<1x128xf32>
    %3 = vector.broadcast %cst_1 : f32 to vector<1x128xf32>
    %4 = arith.minimumf %3, %2 : vector<1x128xf32>
    %c0_2 = arith.constant 0 : index
    %c0_3 = arith.constant 0 : index
    %5 = vector.load %arg4[%c0_2, %c0_3] : memref<1x128xf32, #tpu.memory_space<vmem>>, vector<1x128xf32>
    %cst_4 = arith.constant 0.967216074 : f32
    %cst_5 = arith.constant 0.991701304 : f32
    %6 = vector.broadcast %cst_4 : f32 to vector<1x128xf32>
    %7 = arith.maximumf %6, %5 : vector<1x128xf32>
    %8 = vector.broadcast %cst_5 : f32 to vector<1x128xf32>
    %9 = arith.minimumf %8, %7 : vector<1x128xf32>
    %c0_6 = arith.constant 0 : index
    %c0_7 = arith.constant 0 : index
    %10 = vector.load %arg5[%c0_6, %c0_7] : memref<1x128xf32, #tpu.memory_space<vmem>>, vector<1x128xf32>
    %cst_8 = arith.constant -1.000000e+00 : f32
    %cst_9 = arith.constant 1.000000e+00 : f32
    %11 = vector.broadcast %cst_8 : f32 to vector<1x128xf32>
    %12 = arith.maximumf %11, %10 : vector<1x128xf32>
    %13 = vector.broadcast %cst_9 : f32 to vector<1x128xf32>
    %14 = arith.minimumf %13, %12 : vector<1x128xf32>
    %c0_10 = arith.constant 0 : index
    %c0_11 = arith.constant 0 : index
    %15 = vector.load %arg6[%c0_10, %c0_11] : memref<1x128xf32, #tpu.memory_space<vmem>>, vector<1x128xf32>
    %cst_12 = arith.constant 0.000000e+00 : f32
    %cst_13 = arith.constant 2.000000e+00 : f32
    %16 = vector.broadcast %cst_12 : f32 to vector<1x128xf32>
    %17 = arith.maximumf %16, %15 : vector<1x128xf32>
    %18 = vector.broadcast %cst_13 : f32 to vector<1x128xf32>
    %19 = arith.minimumf %18, %17 : vector<1x128xf32>
    %c0_14 = arith.constant 0 : index
    %c0_15 = arith.constant 0 : index
    %20 = vector.load %arg1[%c0_14, %c0_15] : memref<64x128xbf16, #tpu.memory_space<vmem>>, vector<64x128xbf16>
    %c0_16 = arith.constant 0 : index
    %c0_17 = arith.constant 0 : index
    %21 = vector.load %arg2[%c0_16, %c0_17] : memref<128x128xbf16, #tpu.memory_space<vmem>>, vector<128x128xbf16>
    %cst_18 = arith.constant dense<0.000000e+00> : vector<64x128xf32>
    %22 = tpu.matmul %20, %21, %cst_18 {dimension_numbers = #tpu.dot_dimension_numbers<[1], [0], [0], [1], [0, 0, 1, 1], [], []>} : vector<64x128xbf16>, vector<128x128xbf16>, vector<64x128xf32> -> vector<64x128xf32>
    %cst_19 = arith.constant dense<0.000000e+00> : vector<128xf32>
    %23 = vector.multi_reduction <add>, %22, %cst_19 [0] : vector<64x128xf32> to vector<128xf32>
    %24 = vector.shape_cast %23 : vector<128xf32> to vector<1x128xf32>
    %cst_20 = arith.constant 6.250000e-02 : f32
    %25 = vector.broadcast %cst_20 : f32 to vector<1x128xf32>
    %26 = arith.mulf %24, %25 : vector<1x128xf32>
    %27 = vector.broadcast %26 : vector<1x128xf32> to vector<64x128xf32>
    %28 = arith.subf %22, %27 : vector<64x128xf32>
    %29 = arith.mulf %28, %28 : vector<64x128xf32>
    %cst_21 = arith.constant dense<0.000000e+00> : vector<128xf32>
    %30 = vector.multi_reduction <add>, %29, %cst_21 [0] : vector<64x128xf32> to vector<128xf32>
    %31 = vector.shape_cast %30 : vector<128xf32> to vector<1x128xf32>
    %cst_22 = arith.constant 4.800000e+01 : f32
    %32 = vector.broadcast %cst_22 : f32 to vector<1x128xf32>
    %33 = arith.mulf %32, %26 : vector<1x128xf32>
    %34 = arith.mulf %33, %26 : vector<1x128xf32>
    %35 = arith.subf %31, %34 : vector<1x128xf32>
    %cst_23 = arith.constant 6.250000e-02 : f32
    %36 = vector.broadcast %cst_23 : f32 to vector<1x128xf32>
    %37 = arith.mulf %35, %36 : vector<1x128xf32>
    %cst_24 = arith.constant 0.000000e+00 : f32
    %38 = vector.broadcast %cst_24 : f32 to vector<1x128xf32>
    %39 = arith.maximumf %37, %38 : vector<1x128xf32>
    %cst_25 = arith.constant 9.99999974E-6 : f32
    %40 = vector.broadcast %cst_25 : f32 to vector<1x128xf32>
    %41 = arith.addf %39, %40 : vector<1x128xf32>
    %42 = math.rsqrt %41 : vector<1x128xf32>
    %43 = vector.broadcast %42 : vector<1x128xf32> to vector<64x128xf32>
    %44 = arith.mulf %28, %43 : vector<64x128xf32>
    %45 = vector.shape_cast %44 : vector<64x128xf32> to vector<8x8x128xf32>
    %c0_26 = arith.constant 0 : index
    %c0_27 = arith.constant 0 : index
    %c0_28 = arith.constant 0 : index
    %46 = vector.load %arg7[%c0_26, %c0_27, %c0_28] : memref<8x8x128xf32, #tpu.memory_space<vmem>>, vector<8x8x128xf32>
    tpu.vector_store %arg7[%c0_26, %c0_27, %c0_28], %45 {strides = array<i32>} : memref<8x8x128xf32, #tpu.memory_space<vmem>>, vector<8x8x128xf32>,
    %cst_29 = arith.constant 1.000000e+00 : f32
    %47 = vector.broadcast %cst_29 : f32 to vector<1x128xf32>
    %48 = arith.mulf %9, %47 : vector<1x128xf32>
    %cst_30 = arith.constant 1.000000e+00 : f32
    %49 = vector.broadcast %cst_30 : f32 to vector<1x128xf32>
    %50 = arith.subf %49, %9 : vector<1x128xf32>
    %cst_31 = arith.constant 0.000000e+00 : f32
    %51 = vector.broadcast %cst_31 : f32 to vector<8x128xf32>
    %cst_32 = arith.constant 1.000000e+00 : f32
    %c0_i32 = arith.constant 0 : i32
    %52 = arith.index_cast %c0_i32 : i32 to index
    %c0_33 = arith.constant 0 : index
    %c0_34 = arith.constant 0 : index
    %53 = vector.load %arg7[%52, %c0_33, %c0_34] : memref<8x8x128xf32, #tpu.memory_space<vmem>>, vector<1x8x128xf32>
    %54 = vector.shape_cast %53 : vector<1x8x128xf32> to vector<8x128xf32>
    %55 = vector.broadcast %4 : vector<1x128xf32> to vector<8x128xf32>
    %56 = arith.mulf %55, %51 : vector<8x128xf32>
    %57 = vector.broadcast %14 : vector<1x128xf32> to vector<8x128xf32>
    %58 = arith.mulf %57, %51 : vector<8x128xf32>
    %59 = arith.addf %56, %58 : vector<8x128xf32>
    %60 = vector.broadcast %19 : vector<1x128xf32> to vector<8x128xf32>
    %61 = arith.mulf %60, %51 : vector<8x128xf32>
    %62 = arith.addf %59, %61 : vector<8x128xf32>
    %63 = vector.broadcast %9 : vector<1x128xf32> to vector<8x128xf32>
    %64 = arith.mulf %63, %51 : vector<8x128xf32>
    %65 = vector.broadcast %48 : vector<1x128xf32> to vector<8x128xf32>
    %66 = arith.mulf %65, %51 : vector<8x128xf32>
    %67 = arith.subf %64, %66 : vector<8x128xf32>
    %68 = arith.subf %54, %62 : vector<8x128xf32>
    %69 = vector.broadcast %50 : vector<1x128xf32> to vector<8x128xf32>
    %70 = arith.mulf %69, %68 : vector<8x128xf32>
    %71 = arith.addf %67, %70 : vector<8x128xf32>
    %72 = vector.broadcast %cst_32 : f32 to vector<8x128xf32>
    %73 = arith.cmpf oge, %71, %72 : vector<8x128xf32>
    %74 = arith.extui %73 : vector<8x128xi1> to vector<8x128xi32>
    %75 = arith.sitofp %74 : vector<8x128xi32> to vector<8x128xf32>
    %76 = arith.index_cast %c0_i32 : i32 to index
    %c0_35 = arith.constant 0 : index
    %c0_36 = arith.constant 0 : index
    %77 = vector.load %arg7[%76, %c0_35, %c0_36] : memref<8x8x128xf32, #tpu.memory_space<vmem>>, vector<1x8x128xf32>
    %78 = vector.shape_cast %77 : vector<1x8x128xf32> to vector<8x128xf32>
    %79 = vector.shape_cast %75 : vector<8x128xf32> to vector<1x8x128xf32>
    tpu.vector_store %arg7[%76, %c0_35, %c0_36], %79 {strides = array<i32>} : memref<8x8x128xf32, #tpu.memory_space<vmem>>, vector<1x8x128xf32>,
    %c1_i32 = arith.constant 1 : i32
    %80 = arith.index_cast %c1_i32 : i32 to index
    %c0_37 = arith.constant 0 : index
    %c0_38 = arith.constant 0 : index
    %81 = vector.load %arg7[%80, %c0_37, %c0_38] : memref<8x8x128xf32, #tpu.memory_space<vmem>>, vector<1x8x128xf32>
    %82 = vector.shape_cast %81 : vector<1x8x128xf32> to vector<8x128xf32>
    %83 = vector.broadcast %4 : vector<1x128xf32> to vector<8x128xf32>
    %84 = arith.mulf %83, %62 : vector<8x128xf32>
    %85 = vector.broadcast %14 : vector<1x128xf32> to vector<8x128xf32>
    %86 = arith.mulf %85, %71 : vector<8x128xf32>
    %87 = arith.addf %84, %86 : vector<8x128xf32>
    %88 = vector.broadcast %19 : vector<1x128xf32> to vector<8x128xf32>
    %89 = arith.mulf %88, %75 : vector<8x128xf32>
    %90 = arith.addf %87, %89 : vector<8x128xf32>
    %91 = vector.broadcast %9 : vector<1x128xf32> to vector<8x128xf32>
    %92 = arith.mulf %91, %71 : vector<8x128xf32>
    %93 = vector.broadcast %48 : vector<1x128xf32> to vector<8x128xf32>
    %94 = arith.mulf %93, %75 : vector<8x128xf32>
    %95 = arith.subf %92, %94 : vector<8x128xf32>
    %96 = arith.subf %82, %90 : vector<8x128xf32>
    %97 = vector.broadcast %50 : vector<1x128xf32> to vector<8x128xf32>
    %98 = arith.mulf %97, %96 : vector<8x128xf32>
    %99 = arith.addf %95, %98 : vector<8x128xf32>
    %100 = vector.broadcast %cst_32 : f32 to vector<8x128xf32>
    %101 = arith.cmpf oge, %99, %100 : vector<8x128xf32>
    %102 = arith.extui %101 : vector<8x128xi1> to vector<8x128xi32>
    %103 = arith.sitofp %102 : vector<8x128xi32> to vector<8x128xf32>
    %104 = arith.index_cast %c1_i32 : i32 to index
    %c0_39 = arith.constant 0 : index
    %c0_40 = arith.constant 0 : index
    %105 = vector.load %arg7[%104, %c0_39, %c0_40] : memref<8x8x128xf32, #tpu.memory_space<vmem>>, vector<1x8x128xf32>
    %106 = vector.shape_cast %105 : vector<1x8x128xf32> to vector<8x128xf32>
    %107 = vector.shape_cast %103 : vector<8x128xf32> to vector<1x8x128xf32>
    tpu.vector_store %arg7[%104, %c0_39, %c0_40], %107 {strides = array<i32>} : memref<8x8x128xf32, #tpu.memory_space<vmem>>, vector<1x8x128xf32>,
    %c2_i32 = arith.constant 2 : i32
    %108 = arith.index_cast %c2_i32 : i32 to index
    %c0_41 = arith.constant 0 : index
    %c0_42 = arith.constant 0 : index
    %109 = vector.load %arg7[%108, %c0_41, %c0_42] : memref<8x8x128xf32, #tpu.memory_space<vmem>>, vector<1x8x128xf32>
    %110 = vector.shape_cast %109 : vector<1x8x128xf32> to vector<8x128xf32>
    %111 = vector.broadcast %4 : vector<1x128xf32> to vector<8x128xf32>
    %112 = arith.mulf %111, %90 : vector<8x128xf32>
    %113 = vector.broadcast %14 : vector<1x128xf32> to vector<8x128xf32>
    %114 = arith.mulf %113, %99 : vector<8x128xf32>
    %115 = arith.addf %112, %114 : vector<8x128xf32>
    %116 = vector.broadcast %19 : vector<1x128xf32> to vector<8x128xf32>
    %117 = arith.mulf %116, %103 : vector<8x128xf32>
    %118 = arith.addf %115, %117 : vector<8x128xf32>
    %119 = vector.broadcast %9 : vector<1x128xf32> to vector<8x128xf32>
    %120 = arith.mulf %119, %99 : vector<8x128xf32>
    %121 = vector.broadcast %48 : vector<1x128xf32> to vector<8x128xf32>
    %122 = arith.mulf %121, %103 : vector<8x128xf32>
    %123 = arith.subf %120, %122 : vector<8x128xf32>
    %124 = arith.subf %110, %118 : vector<8x128xf32>
    %125 = vector.broadcast %50 : vector<1x128xf32> to vector<8x128xf32>
    %126 = arith.mulf %125, %124 : vector<8x128xf32>
    %127 = arith.addf %123, %126 : vector<8x128xf32>
    %128 = vector.broadcast %cst_32 : f32 to vector<8x128xf32>
    %129 = arith.cmpf oge, %127, %128 : vector<8x128xf32>
    %130 = arith.extui %129 : vector<8x128xi1> to vector<8x128xi32>
    %131 = arith.sitofp %130 : vector<8x128xi32> to vector<8x128xf32>
    %132 = arith.index_cast %c2_i32 : i32 to index
    %c0_43 = arith.constant 0 : index
    %c0_44 = arith.constant 0 : index
    %133 = vector.load %arg7[%132, %c0_43, %c0_44] : memref<8x8x128xf32, #tpu.memory_space<vmem>>, vector<1x8x128xf32>
    %134 = vector.shape_cast %133 : vector<1x8x128xf32> to vector<8x128xf32>
    %135 = vector.shape_cast %131 : vector<8x128xf32> to vector<1x8x128xf32>
    tpu.vector_store %arg7[%132, %c0_43, %c0_44], %135 {strides = array<i32>} : memref<8x8x128xf32, #tpu.memory_space<vmem>>, vector<1x8x128xf32>,
    %c3_i32 = arith.constant 3 : i32
    %136 = arith.index_cast %c3_i32 : i32 to index
    %c0_45 = arith.constant 0 : index
    %c0_46 = arith.constant 0 : index
    %137 = vector.load %arg7[%136, %c0_45, %c0_46] : memref<8x8x128xf32, #tpu.memory_space<vmem>>, vector<1x8x128xf32>
    %138 = vector.shape_cast %137 : vector<1x8x128xf32> to vector<8x128xf32>
    %139 = vector.broadcast %4 : vector<1x128xf32> to vector<8x128xf32>
    %140 = arith.mulf %139, %118 : vector<8x128xf32>
    %141 = vector.broadcast %14 : vector<1x128xf32> to vector<8x128xf32>
    %142 = arith.mulf %141, %127 : vector<8x128xf32>
    %143 = arith.addf %140, %142 : vector<8x128xf32>
    %144 = vector.broadcast %19 : vector<1x128xf32> to vector<8x128xf32>
    %145 = arith.mulf %144, %131 : vector<8x128xf32>
    %146 = arith.addf %143, %145 : vector<8x128xf32>
    %147 = vector.broadcast %9 : vector<1x128xf32> to vector<8x128xf32>
    %148 = arith.mulf %147, %127 : vector<8x128xf32>
    %149 = vector.broadcast %48 : vector<1x128xf32> to vector<8x128xf32>
    %150 = arith.mulf %149, %131 : vector<8x128xf32>
    %151 = arith.subf %148, %150 : vector<8x128xf32>
    %152 = arith.subf %138, %146 : vector<8x128xf32>
    %153 = vector.broadcast %50 : vector<1x128xf32> to vector<8x128xf32>
    %154 = arith.mulf %153, %152 : vector<8x128xf32>
    %155 = arith.addf %151, %154 : vector<8x128xf32>
    %156 = vector.broadcast %cst_32 : f32 to vector<8x128xf32>
    %157 = arith.cmpf oge, %155, %156 : vector<8x128xf32>
    %158 = arith.extui %157 : vector<8x128xi1> to vector<8x128xi32>
    %159 = arith.sitofp %158 : vector<8x128xi32> to vector<8x128xf32>
    %160 = arith.index_cast %c3_i32 : i32 to index
    %c0_47 = arith.constant 0 : index
    %c0_48 = arith.constant 0 : index
    %161 = vector.load %arg7[%160, %c0_47, %c0_48] : memref<8x8x128xf32, #tpu.memory_space<vmem>>, vector<1x8x128xf32>
    %162 = vector.shape_cast %161 : vector<1x8x128xf32> to vector<8x128xf32>
    %163 = vector.shape_cast %159 : vector<8x128xf32> to vector<1x8x128xf32>
    tpu.vector_store %arg7[%160, %c0_47, %c0_48], %163 {strides = array<i32>} : memref<8x8x128xf32, #tpu.memory_space<vmem>>, vector<1x8x128xf32>,
    %c4_i32 = arith.constant 4 : i32
    %164 = arith.index_cast %c4_i32 : i32 to index
    %c0_49 = arith.constant 0 : index
    %c0_50 = arith.constant 0 : index
    %165 = vector.load %arg7[%164, %c0_49, %c0_50] : memref<8x8x128xf32, #tpu.memory_space<vmem>>, vector<1x8x128xf32>
    %166 = vector.shape_cast %165 : vector<1x8x128xf32> to vector<8x128xf32>
    %167 = vector.broadcast %4 : vector<1x128xf32> to vector<8x128xf32>
    %168 = arith.mulf %167, %146 : vector<8x128xf32>
    %169 = vector.broadcast %14 : vector<1x128xf32> to vector<8x128xf32>
    %170 = arith.mulf %169, %155 : vector<8x128xf32>
    %171 = arith.addf %168, %170 : vector<8x128xf32>
    %172 = vector.broadcast %19 : vector<1x128xf32> to vector<8x128xf32>
    %173 = arith.mulf %172, %159 : vector<8x128xf32>
    %174 = arith.addf %171, %173 : vector<8x128xf32>
    %175 = vector.broadcast %9 : vector<1x128xf32> to vector<8x128xf32>
    %176 = arith.mulf %175, %155 : vector<8x128xf32>
    %177 = vector.broadcast %48 : vector<1x128xf32> to vector<8x128xf32>
    %178 = arith.mulf %177, %159 : vector<8x128xf32>
    %179 = arith.subf %176, %178 : vector<8x128xf32>
    %180 = arith.subf %166, %174 : vector<8x128xf32>
    %181 = vector.broadcast %50 : vector<1x128xf32> to vector<8x128xf32>
    %182 = arith.mulf %181, %180 : vector<8x128xf32>
    %183 = arith.addf %179, %182 : vector<8x128xf32>
    %184 = vector.broadcast %cst_32 : f32 to vector<8x128xf32>
    %185 = arith.cmpf oge, %183, %184 : vector<8x128xf32>
    %186 = arith.extui %185 : vector<8x128xi1> to vector<8x128xi32>
    %187 = arith.sitofp %186 : vector<8x128xi32> to vector<8x128xf32>
    %188 = arith.index_cast %c4_i32 : i32 to index
    %c0_51 = arith.constant 0 : index
    %c0_52 = arith.constant 0 : index
    %189 = vector.load %arg7[%188, %c0_51, %c0_52] : memref<8x8x128xf32, #tpu.memory_space<vmem>>, vector<1x8x128xf32>
    %190 = vector.shape_cast %189 : vector<1x8x128xf32> to vector<8x128xf32>
    %191 = vector.shape_cast %187 : vector<8x128xf32> to vector<1x8x128xf32>
    tpu.vector_store %arg7[%188, %c0_51, %c0_52], %191 {strides = array<i32>} : memref<8x8x128xf32, #tpu.memory_space<vmem>>, vector<1x8x128xf32>,
    %c5_i32 = arith.constant 5 : i32
    %192 = arith.index_cast %c5_i32 : i32 to index
    %c0_53 = arith.constant 0 : index
    %c0_54 = arith.constant 0 : index
    %193 = vector.load %arg7[%192, %c0_53, %c0_54] : memref<8x8x128xf32, #tpu.memory_space<vmem>>, vector<1x8x128xf32>
    %194 = vector.shape_cast %193 : vector<1x8x128xf32> to vector<8x128xf32>
    %195 = vector.broadcast %4 : vector<1x128xf32> to vector<8x128xf32>
    %196 = arith.mulf %195, %174 : vector<8x128xf32>
    %197 = vector.broadcast %14 : vector<1x128xf32> to vector<8x128xf32>
    %198 = arith.mulf %197, %183 : vector<8x128xf32>
    %199 = arith.addf %196, %198 : vector<8x128xf32>
    %200 = vector.broadcast %19 : vector<1x128xf32> to vector<8x128xf32>
    %201 = arith.mulf %200, %187 : vector<8x128xf32>
    %202 = arith.addf %199, %201 : vector<8x128xf32>
    %203 = vector.broadcast %9 : vector<1x128xf32> to vector<8x128xf32>
    %204 = arith.mulf %203, %183 : vector<8x128xf32>
    %205 = vector.broadcast %48 : vector<1x128xf32> to vector<8x128xf32>
    %206 = arith.mulf %205, %187 : vector<8x128xf32>
    %207 = arith.subf %204, %206 : vector<8x128xf32>
    %208 = arith.subf %194, %202 : vector<8x128xf32>
    %209 = vector.broadcast %50 : vector<1x128xf32> to vector<8x128xf32>
    %210 = arith.mulf %209, %208 : vector<8x128xf32>
    %211 = arith.addf %207, %210 : vector<8x128xf32>
    %212 = vector.broadcast %cst_32 : f32 to vector<8x128xf32>
    %213 = arith.cmpf oge, %211, %212 : vector<8x128xf32>
    %214 = arith.extui %213 : vector<8x128xi1> to vector<8x128xi32>
    %215 = arith.sitofp %214 : vector<8x128xi32> to vector<8x128xf32>
    %216 = arith.index_cast %c5_i32 : i32 to index
    %c0_55 = arith.constant 0 : index
    %c0_56 = arith.constant 0 : index
    %217 = vector.load %arg7[%216, %c0_55, %c0_56] : memref<8x8x128xf32, #tpu.memory_space<vmem>>, vector<1x8x128xf32>
    %218 = vector.shape_cast %217 : vector<1x8x128xf32> to vector<8x128xf32>
    %219 = vector.shape_cast %215 : vector<8x128xf32> to vector<1x8x128xf32>
    tpu.vector_store %arg7[%216, %c0_55, %c0_56], %219 {strides = array<i32>} : memref<8x8x128xf32, #tpu.memory_space<vmem>>, vector<1x8x128xf32>,
    %c6_i32 = arith.constant 6 : i32
    %220 = arith.index_cast %c6_i32 : i32 to index
    %c0_57 = arith.constant 0 : index
    %c0_58 = arith.constant 0 : index
    %221 = vector.load %arg7[%220, %c0_57, %c0_58] : memref<8x8x128xf32, #tpu.memory_space<vmem>>, vector<1x8x128xf32>
    %222 = vector.shape_cast %221 : vector<1x8x128xf32> to vector<8x128xf32>
    %223 = vector.broadcast %4 : vector<1x128xf32> to vector<8x128xf32>
    %224 = arith.mulf %223, %202 : vector<8x128xf32>
    %225 = vector.broadcast %14 : vector<1x128xf32> to vector<8x128xf32>
    %226 = arith.mulf %225, %211 : vector<8x128xf32>
    %227 = arith.addf %224, %226 : vector<8x128xf32>
    %228 = vector.broadcast %19 : vector<1x128xf32> to vector<8x128xf32>
    %229 = arith.mulf %228, %215 : vector<8x128xf32>
    %230 = arith.addf %227, %229 : vector<8x128xf32>
    %231 = vector.broadcast %9 : vector<1x128xf32> to vector<8x128xf32>
    %232 = arith.mulf %231, %211 : vector<8x128xf32>
    %233 = vector.broadcast %48 : vector<1x128xf32> to vector<8x128xf32>
    %234 = arith.mulf %233, %215 : vector<8x128xf32>
    %235 = arith.subf %232, %234 : vector<8x128xf32>
    %236 = arith.subf %222, %230 : vector<8x128xf32>
    %237 = vector.broadcast %50 : vector<1x128xf32> to vector<8x128xf32>
    %238 = arith.mulf %237, %236 : vector<8x128xf32>
    %239 = arith.addf %235, %238 : vector<8x128xf32>
    %240 = vector.broadcast %cst_32 : f32 to vector<8x128xf32>
    %241 = arith.cmpf oge, %239, %240 : vector<8x128xf32>
    %242 = arith.extui %241 : vector<8x128xi1> to vector<8x128xi32>
    %243 = arith.sitofp %242 : vector<8x128xi32> to vector<8x128xf32>
    %244 = arith.index_cast %c6_i32 : i32 to index
    %c0_59 = arith.constant 0 : index
    %c0_60 = arith.constant 0 : index
    %245 = vector.load %arg7[%244, %c0_59, %c0_60] : memref<8x8x128xf32, #tpu.memory_space<vmem>>, vector<1x8x128xf32>
    %246 = vector.shape_cast %245 : vector<1x8x128xf32> to vector<8x128xf32>
    %247 = vector.shape_cast %243 : vector<8x128xf32> to vector<1x8x128xf32>
    tpu.vector_store %arg7[%244, %c0_59, %c0_60], %247 {strides = array<i32>} : memref<8x8x128xf32, #tpu.memory_space<vmem>>, vector<1x8x128xf32>,
    %c7_i32 = arith.constant 7 : i32
    %248 = arith.index_cast %c7_i32 : i32 to index
    %c0_61 = arith.constant 0 : index
    %c0_62 = arith.constant 0 : index
    %249 = vector.load %arg7[%248, %c0_61, %c0_62] : memref<8x8x128xf32, #tpu.memory_space<vmem>>, vector<1x8x128xf32>
    %250 = vector.shape_cast %249 : vector<1x8x128xf32> to vector<8x128xf32>
    %251 = vector.broadcast %4 : vector<1x128xf32> to vector<8x128xf32>
    %252 = arith.mulf %251, %230 : vector<8x128xf32>
    %253 = vector.broadcast %14 : vector<1x128xf32> to vector<8x128xf32>
    %254 = arith.mulf %253, %239 : vector<8x128xf32>
    %255 = arith.addf %252, %254 : vector<8x128xf32>
    %256 = vector.broadcast %19 : vector<1x128xf32> to vector<8x128xf32>
    %257 = arith.mulf %256, %243 : vector<8x128xf32>
    %258 = arith.addf %255, %257 : vector<8x128xf32>
    %259 = vector.broadcast %9 : vector<1x128xf32> to vector<8x128xf32>
    %260 = arith.mulf %259, %239 : vector<8x128xf32>
    %261 = vector.broadcast %48 : vector<1x128xf32> to vector<8x128xf32>
    %262 = arith.mulf %261, %243 : vector<8x128xf32>
    %263 = arith.subf %260, %262 : vector<8x128xf32>
    %264 = arith.subf %250, %258 : vector<8x128xf32>
    %265 = vector.broadcast %50 : vector<1x128xf32> to vector<8x128xf32>
    %266 = arith.mulf %265, %264 : vector<8x128xf32>
    %267 = arith.addf %263, %266 : vector<8x128xf32>
    %268 = vector.broadcast %cst_32 : f32 to vector<8x128xf32>
    %269 = arith.cmpf oge, %267, %268 : vector<8x128xf32>
    %270 = arith.extui %269 : vector<8x128xi1> to vector<8x128xi32>
    %271 = arith.sitofp %270 : vector<8x128xi32> to vector<8x128xf32>
    %272 = arith.index_cast %c7_i32 : i32 to index
    %c0_63 = arith.constant 0 : index
    %c0_64 = arith.constant 0 : index
    %273 = vector.load %arg7[%272, %c0_63, %c0_64] : memref<8x8x128xf32, #tpu.memory_space<vmem>>, vector<1x8x128xf32>
    %274 = vector.shape_cast %273 : vector<1x8x128xf32> to vector<8x128xf32>
    %275 = vector.shape_cast %271 : vector<8x128xf32> to vector<1x8x128xf32>
    tpu.vector_store %arg7[%272, %c0_63, %c0_64], %275 {strides = array<i32>} : memref<8x8x128xf32, #tpu.memory_space<vmem>>, vector<1x8x128xf32>,
    %c8_i32 = arith.constant 8 : i32
    return
  }
  func.func @transform_0(%arg0: i32) -> (i32, i32) {
    %c0_i32 = arith.constant 0 : i32
    %c0_i32_0 = arith.constant 0 : i32
    %c0_i32_1 = arith.constant 0 : i32
    return %c0_i32, %c0_i32_0 : i32, i32
  }
  func.func @transform_1(%arg0: i32) -> (i32, i32) {
    %c0_i32 = arith.constant 0 : i32
    %c0_i32_0 = arith.constant 0 : i32
    return %c0_i32, %arg0 : i32, i32
  }
  func.func @transform_2(%arg0: i32) -> (i32, i32) {
    %c0_i32 = arith.constant 0 : i32
    %c0_i32_0 = arith.constant 0 : i32
    return %c0_i32, %arg0 : i32, i32
  }
  func.func @transform_3(%arg0: i32) -> (i32, i32) {
    %c0_i32 = arith.constant 0 : i32
    %c0_i32_0 = arith.constant 0 : i32
    return %c0_i32, %arg0 : i32, i32
  }
  func.func @transform_4(%arg0: i32) -> (i32, i32) {
    %c0_i32 = arith.constant 0 : i32
    %c0_i32_0 = arith.constant 0 : i32
    return %c0_i32, %arg0 : i32, i32
  }
  func.func @transform_5(%arg0: i32) -> (i32, i32) {
    %c0_i32 = arith.constant 0 : i32
    %c0_i32_0 = arith.constant 0 : i32
    return %c0_i32, %arg0 : i32, i32
  }
  func.func @transform_6(%arg0: i32) -> (i32, i32, i32) {
    %c0_i32 = arith.constant 0 : i32
    %c0_i32_0 = arith.constant 0 : i32
    %c0_i32_1 = arith.constant 0 : i32
    return %c0_i32, %c0_i32_0, %arg0 : i32, i32, i32
  }
}

</mosaic_0001>

<bundles_post_ra>
// kernel: _forward_single.1
= control target key start
LH: loop header
LB: loop body
LE: loop exit
PB: predicated region body
PF: predicated region fallthrough
CT: control target
= control target key end

     0   :  { %s718_s1 = inlined_call_operand.vmem [shape: bf16[128,128], index: 1, kind: input, shape index: {}]   ;;  %s719_s0 = inlined_call_operand.vmem [shape: bf16[64,128], index: 0, kind: input, shape index: {}]   ;;  %s720_s2 = inlined_call_operand.vmem [shape: f32[1,128], index: 2, kind: input, shape index: {}]   ;;  %s721_s4 = inlined_call_operand.vmem [shape: f32[1,128], index: 4, kind: input, shape index: {}]   ;;  %s722_s5 = inlined_call_operand.vmem [shape: f32[1,128], index: 5, kind: input, shape index: {}]   ;;  %s723_s3 = inlined_call_operand.vmem [shape: f32[1,128], index: 3, kind: input, shape index: {}]   ;;  %s724_s6 = inlined_call_operand.vmem [shape: f32[8,8,128], index: 6, kind: output, shape index: {}]  }
   0x1   :  { %v471_v0 = vld [vmem:[%s718_s1 + $0x38] sm:$0xff]  ;;  %v470_v1 = vld [vmem:[%s718_s1 + $0x30] sm:$0xff]  ;;  %v469_v2 = vld [vmem:[%s718_s1 + $0x28] sm:$0xff] }
   0x2   :  { %131 = vmatpush.bf16.msra.mxu0 %v471_v0  ;;  %472 = vmatpush.bf16.msra.mxu1 %v471_v0  ;;  %v468_v3 = vld [vmem:[%s718_s1 + $0x20] sm:$0xff]  ;;  %v467_v4 = vld [vmem:[%s718_s1 + $0x18] sm:$0xff]  ;;  %v466_v5 = vld [vmem:[%s718_s1 + $0x10] sm:$0xff] }
   0x3   :  { %473 = vmatpush.bf16.msra.mxu2 %v471_v0  ;;  %474 = vmatpush.bf16.msra.mxu3 %v471_v0  ;;  %v465_v6 = vld [vmem:[%s718_s1 + $0x8] sm:$0xff]  ;;  %v464_v7 = vld [vmem:[%s718_s1] sm:$0xff]  ;;  %v462_v10 = vld [vmem:[%s719_s0 + $0x10] sm:$0xff] }
   0x4   :  { %v460_v8 = vld [vmem:[%s719_s0] sm:$0xff]  ;;  %v461_v9 = vld [vmem:[%s719_s0 + $0x8] sm:$0xff]  ;;  %v463_v11 = vld [vmem:[%s719_s0 + $0x18] sm:$0xff] }
   0x6   :  { %132 = vmatpush.bf16.msra.mxu0 %v470_v1  ;;  %475 = vmatpush.bf16.msra.mxu1 %v470_v1 }
   0x7   :  { %476 = vmatpush.bf16.msra.mxu2 %v470_v1  ;;  %477 = vmatpush.bf16.msra.mxu3 %v470_v1 }
   0xa   :  { %133 = vmatpush.bf16.msra.mxu0 %v469_v2  ;;  %478 = vmatpush.bf16.msra.mxu1 %v469_v2 }
   0xb   :  { %479 = vmatpush.bf16.msra.mxu2 %v469_v2  ;;  %480 = vmatpush.bf16.msra.mxu3 %v469_v2  ;;  %v23_v2 = vld [vmem:[%s720_s2] sm:$0x1] }
   0xe   :  { %134 = vmatpush.bf16.msra.mxu0 %v468_v3  ;;  %481 = vmatpush.bf16.msra.mxu1 %v468_v3 }
   0xf   :  { %482 = vmatpush.bf16.msra.mxu2 %v468_v3  ;;  %483 = vmatpush.bf16.msra.mxu3 %v468_v3 }
  0x12   :  { %135 = vmatpush.bf16.msra.mxu0 %v467_v4  ;;  %484 = vmatpush.bf16.msra.mxu1 %v467_v4 }
  0x13   :  { %485 = vmatpush.bf16.msra.mxu2 %v467_v4  ;;  %486 = vmatpush.bf16.msra.mxu3 %v467_v4  ;;  %v24_v4 = vmax.f32 %v23_v2, 0.8187308 }
  0x16   :  { %136 = vmatpush.bf16.msra.mxu0 %v466_v5  ;;  %487 = vmatpush.bf16.msra.mxu1 %v466_v5 }
  0x17   :  { %488 = vmatpush.bf16.msra.mxu2 %v466_v5  ;;  %489 = vmatpush.bf16.msra.mxu3 %v466_v5 }
  0x1a   :  { %137 = vmatpush.bf16.msra.mxu0 %v465_v6  ;;  %490 = vmatpush.bf16.msra.mxu1 %v465_v6 }
  0x1b   :  { %491 = vmatpush.bf16.msra.mxu2 %v465_v6  ;;  %492 = vmatpush.bf16.msra.mxu3 %v465_v6  ;;  %v29_v6 = vld [vmem:[%s721_s4] sm:$0x1] }
  0x1e   :  { %138 = vmatpush.bf16.msra.mxu0 %v464_v7  ;;  %493 = vmatpush.bf16.msra.mxu1 %v464_v7 }
  0x1f   :  { %494 = vmatpush.bf16.msra.mxu2 %v464_v7  ;;  %495 = vmatpush.bf16.msra.mxu3 %v464_v7  ;;  %v32_v7 = vld [vmem:[%s722_s5] sm:$0x1] }
  0x21   :  { %139 = vmatmul.bf16.vlgmr.msra.gmra.mxu0 %v460_v8  ;;  %144 = vmatmul.bf16.vlgmr.msra.gmra.mxu1 %v461_v9  ;;  %v25_v9 = vmin.f32 %v24_v4, 0.96078944 }
  0x22   :  { %149 = vmatmul.bf16.vlgmr.msra.gmra.mxu2 %v462_v10  ;;  %154 = vmatmul.bf16.vlgmr.msra.gmra.mxu3 %v463_v11  ;;  %v389_v10 = vclamps-f32 %v29_v6, 1.0  ;;  %v33_v11 = vmax.f32 %v32_v7, 0.0 }
  0x9e   :  { %v140_v12 = vpop.f32.mrf.mxu0  ;;  %v145_v13 = vpop.f32.mrf.mxu1 }
  0xa5   :  { %v150_v14 = vpop.f32.mrf.mxu2  ;;  %v155_v17 = vpop.f32.mrf.mxu3 }
  0xa6   :  { %v142_v15 = vpop.f32.mrf.mxu0  ;;  %v147_v19 = vpop.f32.mrf.mxu1 }
  0xa7   :  { %v160_v16 = vadd.f32 %v142_v15, %v140_v12 }
  0xa9   :  { %v161_v18 = vadd.f32 %v160_v16, %v145_v13  ;;  %v609_v16 = vperm.slane %v389_v10, 0 }
  0xab   :  { %v162_v20 = vadd.f32 %v161_v18, %v147_v19 }
  0xad   :  { %v163_v21 = vadd.f32 %v162_v20, %v150_v14  ;;  %v152_v22 = vpop.f32.mrf.mxu2  ;;  %v157_v25 = vpop.f32.mrf.mxu3 }
  0xaf   :  { %v164_v23 = vadd.f32 %v163_v21, %v152_v22  ;;  %v244_v21 = vmul.f32 0.0, %v609_v16 }
  0xb1   :  { %v165_v24 = vadd.f32 %v164_v23, %v155_v17 }
  0xb3   :  { %v166_v26 = vadd.f32 %v165_v24, %v157_v25 }
  0xb5   :  { %v167_v27 = vrot.slane %v166_v26, 4 }
  0xb7   :  { %v168_v28 = vadd.f32 %v167_v27, %v166_v26 }
  0xb9   :  { %v169_v29 = vrot.slane %v168_v28, 2 }
  0xbb   :  { %v170_v30 = vadd.f32 %v169_v29, %v168_v28 }
  0xbd   :  { %v171_v31 = vrot.slane %v170_v30, 1 }
  0xbf   :  { %v172_v32 = vadd.f32 %v171_v31, %v170_v30 }
  0xc1   :  { %v173_v33 = vmul.f32 0.0625, %v172_v32 }
  0xc3   :  { %v571_v34 = vsub.f32 %v140_v12, %v173_v33  ;;  %v573_v35 = vsub.f32 %v142_v15, %v173_v33  ;;  %v575_v36 = vsub.f32 %v145_v13, %v173_v33  ;;  %v577_v37 = vsub.f32 %v147_v19, %v173_v33  ;;  %v26_v12 = vld [vmem:[%s723_s3] sm:$0x1] }
  0xc4   :  { %v583_v40 = vsub.f32 %v150_v14, %v173_v33  ;;  %v587_v43 = vsub.f32 %v152_v22, %v173_v33  ;;  %v180_v46 = vsub.f32 %v155_v17, %v173_v33  ;;  %v181_v49 = vsub.f32 %v157_v25, %v173_v33 }
  0xc5   :  { %v182_v38 = vmul.f32 %v571_v34, %v571_v34  ;;  %v183_v39 = vmul.f32 %v573_v35, %v573_v35  ;;  %v184_v41 = vmul.f32 %v575_v36, %v575_v36  ;;  %v185_v44 = vmul.f32 %v577_v37, %v577_v37 }
  0xc6   :  { %v186_v47 = vmul.f32 %v583_v40, %v583_v40  ;;  %v187_v50 = vmul.f32 %v587_v43, %v587_v43  ;;  %v188_v52 = vmul.f32 %v180_v46, %v180_v46  ;;  %v189_v54 = vmul.f32 %v181_v49, %v181_v49 }
  0xc7   :  { %v190_v42 = vadd.f32 %v183_v39, %v182_v38  ;;  %v203_v61 = vmul.f32 48.0, %v173_v33  ;;  %v27_v13 = vmax.f32 %v26_v12, 0.9672161  ;;  %v34_v14 = vmin.f32 %v33_v11, 2.0 }
  0xc8   :  { %v607_v15 = vperm.slane %v25_v9, 0 }
  0xc9   :  { %v191_v45 = vadd.f32 %v190_v42, %v184_v41  ;;  %v204_v0 = vmul.f32 %v203_v61, %v173_v33  ;;  %v28_v19 = vmin.f32 %v27_v13, 0.9917013  ;;  %v613_v22 = vperm.slane %v34_v14, 0 }
  0xca   :  { %v240_v20 = vmul.f32 0.0, %v607_v15 }
  0xcb   :  { %v192_v48 = vadd.f32 %v191_v45, %v185_v44  ;;  %v249_v26 = vmul.f32 0.0, %v613_v22  ;;  %v616_v27 = vperm.slane %v28_v19, 0  ;;  %v235_v29 = vsub.f32 1.0, %v28_v19 }
  0xcc   :  { %v245_v25 = vadd.f32 %v244_v21, %v240_v20 }
  0xcd   :  { %v193_v51 = vadd.f32 %v192_v48, %v186_v47  ;;  %v254_v32 = vmul.f32 0.0, %v616_v27  ;;  %v623_v39 = vperm.slane %v235_v29, 0 }
  0xce   :  { %v250_v31 = vadd.f32 %v249_v26, %v245_v25 }
  0xcf   :  { %v194_v53 = vadd.f32 %v193_v51, %v187_v50  ;;  %v255_v44 = vsub.f32 %v254_v32, %v254_v32 }
  0xd0   :  { %v268_v50 = vmul.f32 %v250_v31, %v607_v15 }
  0xd1   :  { %v195_v55 = vadd.f32 %v194_v53, %v188_v52  ;;  %v499_v52 = vmov 0.0  }
  0xd3   :  { %v196_v56 = vadd.f32 %v195_v55, %v189_v54 }
  0xd5   :  { %v197_v57 = vrot.slane %v196_v56, 4 }
  0xd7   :  { %v198_v58 = vadd.f32 %v197_v57, %v196_v56 }
  0xd9   :  { %v199_v59 = vrot.slane %v198_v58, 2 }
  0xdb   :  { %v200_v60 = vadd.f32 %v199_v59, %v198_v58 }
  0xdd   :  { %v201_v62 = vrot.slane %v200_v60, 1 }
  0xdf   :  { %v202_v63 = vadd.f32 %v201_v62, %v200_v60 }
  0xe1   :  { %v205_v1 = vsub.f32 %v202_v63, %v204_v0 }
  0xe3   :  { %v206_v3 = vmul.f32 0.0625, %v205_v1 }
  0xe5   :  { %v207_v5 = vmax.f32 %v206_v3, 0.0 }
  0xe7   :  { %v208_v8 = vadd.f32 1e-05, %v207_v5 }
  0xe9   :  { %497 = vrsqrt.f32 %v208_v8  ;;  %vm215_vm1 = vweird.f32 %v208_v8 }
  0xef   :  { %v498_v17 = vpop.eup %497 }
  0xf0   :  { %v210_v18 = vmul.f32 %v498_v17, %v208_v8  ;;  %vm216_vm0 = vweird.f32 %v498_v17 }
  0xf1   :  { %vm217_vm2 = vmor %vm215_vm1, %vm216_vm0 }
  0xf2   :  { %v211_v23 = vmul.f32 %v498_v17, %v210_v18 }
  0xf4   :  { %v212_v24 = vmul.f32 0.5, %v211_v23 }
  0xf6   :  { %v213_v28 = vsub.f32 1.5, %v212_v24 }
  0xf8   :  { %v214_v30 = vmul.f32 %v498_v17, %v213_v28 }
  0xfa   :  { %v619_v33 = vsel %vm217_vm2, %v498_v17, %v214_v30 }
  0xfb   :  { %v219_v38 = vmul.f32 %v619_v33, %v571_v34  ;;  %v626_v41 = vmul.f32 %v619_v33, %v180_v46  ;;  %v629_v42 = vmul.f32 %v619_v33, %v181_v49  ;;  %v220_v53 = vmul.f32 %v619_v33, %v573_v35 }
  0xfc   :  { %v221_v1 = vmul.f32 %v619_v33, %v575_v36  ;;  %v222_v13 = vmul.f32 %v619_v33, %v577_v37  ;;  %v223_v29 = vmul.f32 %v619_v33, %v583_v40 }
  0xfd   :  { %v256_v45 = vsub.f32 %v219_v38, %v250_v31 }
  0xff   :  { %v260_v47 = vmul.f32 %v623_v39, %v256_v45 }
 0x101   :  { %v261_v48 = vadd.f32 %v260_v47, %v255_v44 }
 0x103   :  { %vm262_vm3 = vcmp.ge.f32.partialorder %v261_v48, 1.0  ;;  %v269_v51 = vmul.f32 %v261_v48, %v609_v16  ;;  %v273_v56 = vmul.f32 %v261_v48, %v616_v27 }
 0x104   :  { %v438_v34 = vsel %vm262_vm3, 1.0, %v499_v52 }
 0x105   :  { %265 = vst [vmem:[%s724_s6] sm:$0xff] %v438_v34  ;;  %v270_v46 = vadd.f32 %v269_v51, %v268_v50  ;;  %v271_v49 = vmul.f32 %v438_v34, %v613_v22  ;;  %v274_v55 = vmul.f32 %v438_v34, %v616_v27 }
 0x107   :  { %v272_v54 = vadd.f32 %v271_v49, %v270_v46  ;;  %v275_v58 = vsub.f32 %v273_v56, %v274_v55  ;;  %v224_v46 = vmul.f32 %v619_v33, %v587_v43 }
 0x109   :  { %v276_v57 = vsub.f32 %v220_v53, %v272_v54  ;;  %v285_v61 = vmul.f32 %v272_v54, %v607_v15 }
 0x10b   :  { %v277_v59 = vmul.f32 %v276_v57, %v623_v39 }
 0x10d   :  { %v278_v60 = vadd.f32 %v277_v59, %v275_v58 }
 0x10f   :  { %vm279_vm4 = vcmp.ge.f32.partialorder %v278_v60, 1.0  ;;  %v286_v62 = vmul.f32 %v278_v60, %v609_v16  ;;  %v290_v4 = vmul.f32 %v278_v60, %v616_v27 }
 0x110   :  { %v440_v63 = vsel %vm279_vm4, 1.0, %v499_v52 }
 0x111   :  { %441 = vst [vmem:[%s724_s6 + $0x8] sm:$0xff] %v440_v63  ;;  %v287_v35 = vadd.f32 %v286_v62, %v285_v61  ;;  %v288_v0 = vmul.f32 %v440_v63, %v613_v22  ;;  %v291_v3 = vmul.f32 %v440_v63, %v616_v27 }
 0x113   :  { %v289_v2 = vadd.f32 %v288_v0, %v287_v35  ;;  %v292_v6 = vsub.f32 %v290_v4, %v291_v3 }
 0x115   :  { %v293_v5 = vsub.f32 %v221_v1, %v289_v2  ;;  %v302_v9 = vmul.f32 %v289_v2, %v607_v15 }
 0x117   :  { %v294_v7 = vmul.f32 %v293_v5, %v623_v39 }
 0x119   :  { %v295_v8 = vadd.f32 %v294_v7, %v292_v6 }
 0x11b   :  { %vm296_vm5 = vcmp.ge.f32.partialorder %v295_v8, 1.0  ;;  %v303_v10 = vmul.f32 %v295_v8, %v609_v16  ;;  %v307_v18 = vmul.f32 %v295_v8, %v616_v27 }
 0x11c   :  { %v443_v11 = vsel %vm296_vm5, 1.0, %v499_v52 }
 0x11d   :  { %444 = vst [vmem:[%s724_s6 + $0x10] sm:$0xff] %v443_v11  ;;  %v304_v36 = vadd.f32 %v303_v10, %v302_v9  ;;  %v305_v12 = vmul.f32 %v443_v11, %v613_v22  ;;  %v308_v17 = vmul.f32 %v443_v11, %v616_v27 }
 0x11f   :  { %v306_v14 = vadd.f32 %v305_v12, %v304_v36  ;;  %v309_v20 = vsub.f32 %v307_v18, %v308_v17 }
 0x121   :  { %v310_v19 = vsub.f32 %v222_v13, %v306_v14  ;;  %v319_v24 = vmul.f32 %v306_v14, %v607_v15 }
 0x123   :  { %v311_v21 = vmul.f32 %v310_v19, %v623_v39 }
 0x125   :  { %v312_v23 = vadd.f32 %v311_v21, %v309_v20 }
 0x127   :  { %vm313_vm6 = vcmp.ge.f32.partialorder %v312_v23, 1.0  ;;  %v320_v25 = vmul.f32 %v312_v23, %v609_v16  ;;  %v324_v32 = vmul.f32 %v312_v23, %v616_v27 }
 0x128   :  { %v446_v26 = vsel %vm313_vm6, 1.0, %v499_v52 }
 0x129   :  { %447 = vst [vmem:[%s724_s6 + $0x18] sm:$0xff] %v446_v26  ;;  %v321_v37 = vadd.f32 %v320_v25, %v319_v24  ;;  %v322_v28 = vmul.f32 %v446_v26, %v613_v22  ;;  %v325_v31 = vmul.f32 %v446_v26, %v616_v27 }
 0x12b   :  { %v323_v30 = vadd.f32 %v322_v28, %v321_v37  ;;  %v326_v44 = vsub.f32 %v324_v32, %v325_v31 }
 0x12d   :  { %v327_v38 = vsub.f32 %v223_v29, %v323_v30  ;;  %v336_v48 = vmul.f32 %v323_v30, %v607_v15 }
 0x12f   :  { %v328_v45 = vmul.f32 %v327_v38, %v623_v39 }
 0x131   :  { %v329_v47 = vadd.f32 %v328_v45, %v326_v44 }
 0x133   :  { %vm330_vm7 = vcmp.ge.f32.partialorder %v329_v47, 1.0  ;;  %v337_v50 = vmul.f32 %v329_v47, %v609_v16  ;;  %v341_v54 = vmul.f32 %v329_v47, %v616_v27 }
 0x134   :  { %v449_v51 = vsel %vm330_vm7, 1.0, %v499_v52 }
 0x135   :  { %450 = vst [vmem:[%s724_s6 + $0x20] sm:$0xff] %v449_v51  ;;  %v338_v40 = vadd.f32 %v337_v50, %v336_v48  ;;  %v339_v34 = vmul.f32 %v449_v51, %v613_v22  ;;  %v342_v53 = vmul.f32 %v449_v51, %v616_v27 }
 0x137   :  { %v340_v49 = vadd.f32 %v339_v34, %v338_v40  ;;  %v343_v56 = vsub.f32 %v341_v54, %v342_v53 }
 0x139   :  { %v344_v55 = vsub.f32 %v224_v46, %v340_v49  ;;  %v353_v59 = vmul.f32 %v340_v49, %v607_v15 }
 0x13b   :  { %v345_v57 = vmul.f32 %v344_v55, %v623_v39 }
 0x13d   :  { %v346_v58 = vadd.f32 %v345_v57, %v343_v56 }
 0x13f   :  { %vm347_vm8 = vcmp.ge.f32.partialorder %v346_v58, 1.0  ;;  %v354_v60 = vmul.f32 %v346_v58, %v609_v16  ;;  %v358_v35 = vmul.f32 %v346_v58, %v616_v27 }
 0x140   :  { %v452_v61 = vsel %vm347_vm8, 1.0, %v499_v52 }
 0x141   :  { %453 = vst [vmem:[%s724_s6 + $0x28] sm:$0xff] %v452_v61  ;;  %v355_v43 = vadd.f32 %v354_v60, %v353_v59  ;;  %v356_v33 = vmul.f32 %v452_v61, %v613_v22  ;;  %v359_v63 = vmul.f32 %v452_v61, %v616_v27 }
 0x143   :  { %v357_v62 = vadd.f32 %v356_v33, %v355_v43  ;;  %v360_v1 = vsub.f32 %v358_v35, %v359_v63 }
 0x145   :  { %v361_v0 = vsub.f32 %v626_v41, %v357_v62  ;;  %v370_v4 = vmul.f32 %v357_v62, %v607_v15 }
 0x147   :  { %v362_v2 = vmul.f32 %v361_v0, %v623_v39 }
 0x149   :  { %v363_v3 = vadd.f32 %v362_v2, %v360_v1 }
 0x14b   :  { %vm364_vm9 = vcmp.ge.f32.partialorder %v363_v3, 1.0  ;;  %v371_v5 = vmul.f32 %v363_v3, %v609_v16  ;;  %v375_v10 = vmul.f32 %v363_v3, %v616_v27 }
 0x14c   :  { %v455_v6 = vsel %vm364_vm9, 1.0, %v499_v52 }
 0x14d   :  { %456 = vst [vmem:[%s724_s6 + $0x30] sm:$0xff] %v455_v6  ;;  %v372_v7 = vadd.f32 %v371_v5, %v370_v4  ;;  %v373_v8 = vmul.f32 %v455_v6, %v613_v22  ;;  %v376_v41 = vmul.f32 %v455_v6, %v616_v27 }
 0x14f   :  { %v374_v9 = vadd.f32 %v373_v8, %v372_v7  ;;  %v377_v36 = vsub.f32 %v375_v10, %v376_v41 }
 0x151   :  { %v378_v11 = vsub.f32 %v629_v42, %v374_v9 }
 0x153   :  { %v379_v15 = vmul.f32 %v378_v11, %v623_v39 }
 0x155   :  { %v380_v16 = vadd.f32 %v379_v15, %v377_v36 }
 0x157   :  { %vm381_vm10 = vcmp.ge.f32.partialorder %v380_v16, 1.0 }
 0x158   :  { %v458_v12 = vsel %vm381_vm10, 1.0, %v499_v52 }
 0x159   :  { %459 = vst [vmem:[%s724_s6 + $0x38] sm:$0xff] %v458_v12 }

</bundles_post_ra>
